<compile_context>
chip_gen: v6e
topology: v6e:2x2x1
jax: 0.10.0
libtpu: 0.0.40
codegen_flags: <defaults>
</compile_context>

<pallas_src>
import jax
import jax.numpy as jnp
from jax.experimental import pallas as pl
from jax.experimental.pallas import tpu as pltpu

LANE = 128


def _round_up(x, m):
    return (x + m - 1) // m * m


def _vmem_capacity_bytes():
    # Per-TensorCore VMEM; conservative v7x fallback if the query is missing.
    try:
        info = pltpu.get_tpu_info()
        cap = getattr(info, "vmem_capacity_bytes", None)
        if cap:
            return int(cap)
    except Exception:
        pass
    return 64 * 2**20


def _vmem_bytes(tb, d_in, l1p, l2p, n_pad, cbytes):
    # double-buffered x/out tiles + (double-buffered) resident weights/biases
    # + f32 live intermediates (h1, h2) that the compiler may spill to VMEM.
    act = 2 * tb * d_in * 4 + 2 * tb * n_pad * cbytes
    wgt = 2 * ((d_in * l1p + l1p * l2p + l2p * n_pad) * cbytes
               + (l1p + l2p + n_pad) * 4)
    live = tb * (l1p + l2p) * 4
    return act + wgt + live


def _choose_tile_batch(B, d_in, l1p, l2p, n_pad, cbytes, vmem_cap):
    # Big batch tiles amortize the ~0.35us per-grid-step overhead; budget is
    # generation aware (128 MiB parts allow much larger tiles than v7x).
    budget = min(int(0.6 * vmem_cap), 100 * 2**20)
    cap = 2048 if vmem_cap >= 96 * 2**20 else 512
    tb = min(_round_up(max(B, 8), 8), cap)
    while tb > 8 and _vmem_bytes(tb, d_in, l1p, l2p, n_pad, cbytes) > budget:
        tb = _round_up(tb // 2, 8)
    # Guarantee >= 2 grid steps when possible so the "parallel" batch axis can
    # shard across v7x's 2 TensorCores (negligible cost on 1-TC parts).
    b8 = _round_up(B, 8)
    if B > 8 and pl.cdiv(b8, tb) < 2:
        tb = max(8, _round_up(pl.cdiv(b8, 2), 8))
    return tb


def mlp_kernel(x_ref, w1_ref, b1_ref, w2_ref, b2_ref, w3_ref, b3_ref, o_ref):
    # Fused 3-layer MLP.  MXU inputs in the compute dtype (bf16 by default),
    # f32 accumulation (preferred_element_type), f32 bias add + ReLU.
    # Intermediates stay live in registers / compiler-managed VMEM -- no
    # explicit scratch round-trip between the matmuls.
    cdt = w1_ref.dtype
    x = x_ref[...].astype(cdt)
    h1 = jnp.dot(x, w1_ref[...], preferred_element_type=jnp.float32)
    h1 = jnp.maximum(h1 + b1_ref[...], 0.0).astype(cdt)
    h2 = jnp.dot(h1, w2_ref[...], preferred_element_type=jnp.float32)
    h2 = jnp.maximum(h2 + b2_ref[...], 0.0).astype(cdt)
    o = jnp.dot(h2, w3_ref[...], preferred_element_type=jnp.float32)
    o_ref[...] = (o + b3_ref[...]).astype(o_ref.dtype)


def prepare_params(params, compute_dtype=jnp.bfloat16):
    """One-time: pad hidden/output widths to 128 lanes and cast weights to the
    compute dtype.  Call once and reuse across forward calls."""
    cdt = jnp.dtype(compute_dtype)
    w1, b1 = params["w1"], params["b1"]
    w2, b2 = params["w2"], params["b2"]
    w3, b3 = params["w3"], params["b3"]
    d_in, l1 = w1.shape
    l2, n_action = w3.shape
    l1p, l2p, n_pad = (_round_up(l1, LANE), _round_up(l2, LANE),
                       _round_up(n_action, LANE))

    def pad2(a, r, c):
        return jnp.zeros((r, c), a.dtype).at[:a.shape[0], :a.shape[1]].set(a)

    return {
        "w1": pad2(w1, d_in, l1p).astype(cdt),
        "b1": pad2(b1.reshape(1, -1), 1, l1p).astype(jnp.float32),
        "w2": pad2(w2, l1p, l2p).astype(cdt),
        "b2": pad2(b2.reshape(1, -1), 1, l2p).astype(jnp.float32),
        "w3": pad2(w3, l2p, n_pad).astype(cdt),
        "b3": pad2(b3.reshape(1, -1), 1, n_pad).astype(jnp.float32),
        "n_action": int(n_action),
    }


def two_layer_net_forward(x, prepared):
    """x: (B, inputdim) f32.  prepared: output of prepare_params().
    Returns (B, n_action) in the compute dtype (f32 if prepared with f32)."""
    w1, b1 = prepared["w1"], prepared["b1"]
    w2, b2 = prepared["w2"], prepared["b2"]
    w3, b3 = prepared["w3"], prepared["b3"]
    n_action = prepared["n_action"]

    B, d_in = x.shape
    l1p, l2p, n_pad = w1.shape[1], w2.shape[1], w3.shape[1]
    cdt = jnp.dtype(w1.dtype)
    cbytes = cdt.itemsize

    vmem_cap = _vmem_capacity_bytes()
    tb = _choose_tile_batch(B, d_in, l1p, l2p, n_pad, cbytes, vmem_cap)

    # Only copy x if the batch is not a multiple of 8 (sublane requirement);
    # partial trailing blocks (b8 % tb != 0) are handled by masked stores.
    b8 = _round_up(B, 8)
    xp = x if b8 == B else jnp.zeros((b8, d_in), x.dtype).at[:B].set(x)
    grid = (pl.cdiv(b8, tb),)

    needed = _vmem_bytes(tb, d_in, l1p, l2p, n_pad, cbytes)
    # Keep headroom under the physical per-core VMEM (compiler scratch +
    # pipeline buffers share it): ~51 MiB on v7x, <=100 MiB on 128 MiB parts.
    vmem_limit = int(min(max(2 * needed, 16 * 2**20),
                         int(0.8 * vmem_cap), 100 * 2**20))

    cost = pl.CostEstimate(
        flops=2 * b8 * (d_in * l1p + l1p * l2p + l2p * n_pad),
        transcendentals=0,
        bytes_accessed=(xp.size * 4
                        + (w1.size + w2.size + w3.size) * cbytes
                        + (b1.size + b2.size + b3.size) * 4
                        + b8 * n_pad * cbytes),
    )

    const = lambda i: (0, 0)
    out = pl.pallas_call(
        mlp_kernel,
        out_shape=jax.ShapeDtypeStruct((b8, n_pad), cdt),
        grid=grid,
        in_specs=[
            pl.BlockSpec((tb, d_in), lambda i: (i, 0)),   # x tile (pipelined)
            pl.BlockSpec((d_in, l1p), const),             # weights: resident
            pl.BlockSpec((1, l1p), const),
            pl.BlockSpec((l1p, l2p), const),
            pl.BlockSpec((1, l2p), const),
            pl.BlockSpec((l2p, n_pad), const),
            pl.BlockSpec((1, n_pad), const),
        ],
        out_specs=pl.BlockSpec((tb, n_pad), lambda i: (i, 0)),
        compiler_params=pltpu.CompilerParams(
            dimension_semantics=("parallel",),
            vmem_limit_bytes=vmem_limit),
        cost_estimate=cost,
    )(xp, w1, b1, w2, b2, w3, b3)

    return out[:B, :n_action]


def init_params(key, inputdim, layer1dim, layer2dim, n_action):
    # Deterministic init mimicking PyTorch nn.Linear default:
    # U(-1/sqrt(fan_in), 1/sqrt(fan_in)) for both weight and bias.
    keys = jax.random.split(key, 6)

    def linear(kw, kb, fan_in, fan_out):
        bound = 1.0 / jnp.sqrt(jnp.float32(fan_in))
        w = jax.random.uniform(kw, (fan_in, fan_out), jnp.float32, -bound, bound)
        b = jax.random.uniform(kb, (1, fan_out), jnp.float32, -bound, bound)
        return w, b

    w1, b1 = linear(keys[0], keys[1], inputdim, layer1dim)
    w2, b2 = linear(keys[2], keys[3], layer1dim, layer2dim)
    w3, b3 = linear(keys[4], keys[5], layer2dim, n_action)
    return {"w1": w1, "b1": b1, "w2": w2, "b2": b2, "w3": w3, "b3": b3}


def _reference(x, params, compute_dtype):
    # Pure-JAX reference following the same precision path as the kernel.
    cdt = jnp.dtype(compute_dtype)
    h1 = jnp.maximum(
        jnp.dot(x.astype(cdt), params["w1"].astype(cdt),
                preferred_element_type=jnp.float32) + params["b1"], 0.0)
    h2 = jnp.maximum(
        jnp.dot(h1.astype(cdt), params["w2"].astype(cdt),
                preferred_element_type=jnp.float32) + params["b2"], 0.0)
    return (jnp.dot(h2.astype(cdt), params["w3"].astype(cdt),
                    preferred_element_type=jnp.float32) + params["b3"])


if __name__ == "__main__":
    # TODO(synk): nn.MSELoss / torch.optim.Adam are training-time attributes
    # with no forward-pass equivalent; only forward() is implemented here.
    inputdim, layer1dim, layer2dim, n_action = 16, 32, 32, 4
    batch = 8

    key = jax.random.PRNGKey(0)
    kx, kp = jax.random.split(key)
    x = jax.random.normal(kx, (batch, inputdim), jnp.float32)
    params = init_params(kp, inputdim, layer1dim, layer2dim, n_action)

    # bf16-MXU path (default, recommended): pad/cast params once, reuse.
    prep_bf16 = prepare_params(params, jnp.bfloat16)
    out_bf16 = jax.block_until_ready(two_layer_net_forward(x, prep_bf16))
    ref_bf16 = _reference(x, params, jnp.bfloat16)
    assert out_bf16.shape == (batch, n_action)
    assert jnp.allclose(out_bf16.astype(jnp.float32), ref_bf16,
                        atol=3e-2, rtol=3e-2)

    # f32 path: exact parity with the PyTorch module's numerics.
    prep_f32 = prepare_params(params, jnp.float32)
    out_f32 = jax.block_until_ready(two_layer_net_forward(x, prep_f32))
    ref_f32 = _reference(x, params, jnp.float32)
    assert out_f32.shape == (batch, n_action)
    assert jnp.allclose(out_f32, ref_f32, atol=1e-5, rtol=1e-5)

    print("KERNEL_OK")
</pallas_src>

<mosaic_0001>
module attributes {stable_mosaic.version = 11 : i64} {
  func.func @mlp_kernel(%arg0: i32, %arg1: memref<8x16xf32, #tpu.memory_space<vmem>>, %arg2: memref<16x128xbf16, #tpu.memory_space<vmem>>, %arg3: memref<1x128xf32, #tpu.memory_space<vmem>>, %arg4: memref<128x128xbf16, #tpu.memory_space<vmem>>, %arg5: memref<1x128xf32, #tpu.memory_space<vmem>>, %arg6: memref<128x128xbf16, #tpu.memory_space<vmem>>, %arg7: memref<1x128xf32, #tpu.memory_space<vmem>>, %arg8: memref<8x128xbf16, #tpu.memory_space<vmem>>) attributes {dimension_semantics = [#tpu.dimension_semantics<parallel>], iteration_bounds = array<i64: 1>, scalar_prefetch = 0 : i64, scratch_operands = 0 : i64, tpu.core_type = #tpu.core_type<tc>, window_params = [{transform_indices = @transform_0, window_bounds = array<i64: 8, 16>}, {pipeline_mode = #tpu.pipeline_mode<synchronous>, transform_indices = @transform_1, window_bounds = array<i64: 16, 128>}, {pipeline_mode = #tpu.pipeline_mode<synchronous>, transform_indices = @transform_2, window_bounds = array<i64: 1, 128>}, {pipeline_mode = #tpu.pipeline_mode<synchronous>, transform_indices = @transform_3, window_bounds = array<i64: 128, 128>}, {pipeline_mode = #tpu.pipeline_mode<synchronous>, transform_indices = @transform_4, window_bounds = array<i64: 1, 128>}, {pipeline_mode = #tpu.pipeline_mode<synchronous>, transform_indices = @transform_5, window_bounds = array<i64: 128, 128>}, {pipeline_mode = #tpu.pipeline_mode<synchronous>, transform_indices = @transform_6, window_bounds = array<i64: 1, 128>}, {transform_indices = @transform_7, window_bounds = array<i64: 8, 128>}]} {
    %c0 = arith.constant 0 : index
    %c0_0 = arith.constant 0 : index
    %0 = vector.load %arg1[%c0, %c0_0] : memref<8x16xf32, #tpu.memory_space<vmem>>, vector<8x16xf32>
    %1 = arith.truncf %0 : vector<8x16xf32> to vector<8x16xbf16>
    %c0_1 = arith.constant 0 : index
    %c0_2 = arith.constant 0 : index
    %2 = vector.load %arg2[%c0_1, %c0_2] : memref<16x128xbf16, #tpu.memory_space<vmem>>, vector<16x128xbf16>
    %cst = arith.constant dense<0.000000e+00> : vector<8x128xf32>
    %3 = tpu.matmul %1, %2, %cst {dimension_numbers = #tpu.dot_dimension_numbers<[1], [0], [0], [1], [0, 0, 1, 1], [], []>} : vector<8x16xbf16>, vector<16x128xbf16>, vector<8x128xf32> -> vector<8x128xf32>
    %c0_3 = arith.constant 0 : index
    %c0_4 = arith.constant 0 : index
    %4 = vector.load %arg3[%c0_3, %c0_4] : memref<1x128xf32, #tpu.memory_space<vmem>>, vector<1x128xf32>
    %5 = vector.broadcast %4 : vector<1x128xf32> to vector<8x128xf32>
    %6 = arith.addf %3, %5 : vector<8x128xf32>
    %cst_5 = arith.constant 0.000000e+00 : f32
    %7 = vector.broadcast %cst_5 : f32 to vector<8x128xf32>
    %8 = arith.maximumf %6, %7 : vector<8x128xf32>
    %9 = arith.truncf %8 : vector<8x128xf32> to vector<8x128xbf16>
    %c0_6 = arith.constant 0 : index
    %c0_7 = arith.constant 0 : index
    %10 = vector.load %arg4[%c0_6, %c0_7] : memref<128x128xbf16, #tpu.memory_space<vmem>>, vector<128x128xbf16>
    %cst_8 = arith.constant dense<0.000000e+00> : vector<8x128xf32>
    %11 = tpu.matmul %9, %10, %cst_8 {dimension_numbers = #tpu.dot_dimension_numbers<[1], [0], [0], [1], [0, 0, 1, 1], [], []>} : vector<8x128xbf16>, vector<128x128xbf16>, vector<8x128xf32> -> vector<8x128xf32>
    %c0_9 = arith.constant 0 : index
    %c0_10 = arith.constant 0 : index
    %12 = vector.load %arg5[%c0_9, %c0_10] : memref<1x128xf32, #tpu.memory_space<vmem>>, vector<1x128xf32>
    %13 = vector.broadcast %12 : vector<1x128xf32> to vector<8x128xf32>
    %14 = arith.addf %11, %13 : vector<8x128xf32>
    %cst_11 = arith.constant 0.000000e+00 : f32
    %15 = vector.broadcast %cst_11 : f32 to vector<8x128xf32>
    %16 = arith.maximumf %14, %15 : vector<8x128xf32>
    %17 = arith.truncf %16 : vector<8x128xf32> to vector<8x128xbf16>
    %c0_12 = arith.constant 0 : index
    %c0_13 = arith.constant 0 : index
    %18 = vector.load %arg6[%c0_12, %c0_13] : memref<128x128xbf16, #tpu.memory_space<vmem>>, vector<128x128xbf16>
    %cst_14 = arith.constant dense<0.000000e+00> : vector<8x128xf32>
    %19 = tpu.matmul %17, %18, %cst_14 {dimension_numbers = #tpu.dot_dimension_numbers<[1], [0], [0], [1], [0, 0, 1, 1], [], []>} : vector<8x128xbf16>, vector<128x128xbf16>, vector<8x128xf32> -> vector<8x128xf32>
    %c0_15 = arith.constant 0 : index
    %c0_16 = arith.constant 0 : index
    %20 = vector.load %arg7[%c0_15, %c0_16] : memref<1x128xf32, #tpu.memory_space<vmem>>, vector<1x128xf32>
    %21 = vector.broadcast %20 : vector<1x128xf32> to vector<8x128xf32>
    %22 = arith.addf %19, %21 : vector<8x128xf32>
    %23 = arith.truncf %22 : vector<8x128xf32> to vector<8x128xbf16>
    %c0_17 = arith.constant 0 : index
    %c0_18 = arith.constant 0 : index
    %24 = vector.load %arg8[%c0_17, %c0_18] : memref<8x128xbf16, #tpu.memory_space<vmem>>, vector<8x128xbf16>
    tpu.vector_store %arg8[%c0_17, %c0_18], %23 {strides = array<i32>} : memref<8x128xbf16, #tpu.memory_space<vmem>>, vector<8x128xbf16>,
    return
  }
  func.func @transform_0(%arg0: i32) -> (i32, i32) {
    %c0_i32 = arith.constant 0 : i32
    %c0_i32_0 = arith.constant 0 : i32
    return %arg0, %c0_i32 : i32, i32
  }
  func.func @transform_1(%arg0: i32) -> (i32, i32) {
    %c0_i32 = arith.constant 0 : i32
    %c0_i32_0 = arith.constant 0 : i32
    %c0_i32_1 = arith.constant 0 : i32
    return %c0_i32, %c0_i32_0 : i32, i32
  }
  func.func @transform_2(%arg0: i32) -> (i32, i32) {
    %c0_i32 = arith.constant 0 : i32
    %c0_i32_0 = arith.constant 0 : i32
    %c0_i32_1 = arith.constant 0 : i32
    return %c0_i32, %c0_i32_0 : i32, i32
  }
  func.func @transform_3(%arg0: i32) -> (i32, i32) {
    %c0_i32 = arith.constant 0 : i32
    %c0_i32_0 = arith.constant 0 : i32
    %c0_i32_1 = arith.constant 0 : i32
    return %c0_i32, %c0_i32_0 : i32, i32
  }
  func.func @transform_4(%arg0: i32) -> (i32, i32) {
    %c0_i32 = arith.constant 0 : i32
    %c0_i32_0 = arith.constant 0 : i32
    %c0_i32_1 = arith.constant 0 : i32
    return %c0_i32, %c0_i32_0 : i32, i32
  }
  func.func @transform_5(%arg0: i32) -> (i32, i32) {
    %c0_i32 = arith.constant 0 : i32
    %c0_i32_0 = arith.constant 0 : i32
    %c0_i32_1 = arith.constant 0 : i32
    return %c0_i32, %c0_i32_0 : i32, i32
  }
  func.func @transform_6(%arg0: i32) -> (i32, i32) {
    %c0_i32 = arith.constant 0 : i32
    %c0_i32_0 = arith.constant 0 : i32
    %c0_i32_1 = arith.constant 0 : i32
    return %c0_i32, %c0_i32_0 : i32, i32
  }
  func.func @transform_7(%arg0: i32) -> (i32, i32) {
    %c0_i32 = arith.constant 0 : i32
    %c0_i32_0 = arith.constant 0 : i32
    return %arg0, %c0_i32 : i32, i32
  }
}

</mosaic_0001>

<bundles_post_ra>
// kernel: tpu_custom_call.1
= control target key start
LH: loop header
LB: loop body
LE: loop exit
PB: predicated region body
PF: predicated region fallthrough
CT: control target
= control target key end

     0   :  { %12 = vsyncpa [#allocation3], 0  ;;  %s710_s0 = inlined_call_operand.hbm [shape: f32[8,16], index: 0, kind: input, shape index: {}]   ;;  %s711_s1 = inlined_call_operand.hbm [shape: bf16[16,128], index: 1, kind: input, shape index: {}]   ;;  %s712_s2 = inlined_call_operand.vmem [shape: f32[1,128], index: 2, kind: input, shape index: {}]   ;;  %s713_s3 = inlined_call_operand.hbm [shape: bf16[128,128], index: 3, kind: input, shape index: {}]   ;;  %s714_s4 = inlined_call_operand.vmem [shape: f32[1,128], index: 4, kind: input, shape index: {}]   ;;  %s715_s5 = inlined_call_operand.hbm [shape: bf16[128,128], index: 5, kind: input, shape index: {}]   ;;  %s716_s6 = inlined_call_operand.vmem [shape: f32[1,128], index: 6, kind: input, shape index: {}]   ;;  %s717_s7 = inlined_call_operand.hbm [shape: bf16[8,128], index: 7, kind: output, shape index: {}]  }
   0x1   :  { %13 = vsyncpa [#allocation6], 0 }
   0x2   :  { %14 = vsyncpa [#allocation9], 0 }
   0x3   :  { %15 = vsyncpa [#allocation4], 0  ;;  %s608_s24 = smov [#allocation5]  }
   0x4   :  { %s31_s25 = sshll.u32 %s608_s24, 4  ;;  %s32_s25 = int_to_ptr.vmem [resolvable:$true] %s31_s25 }
   0x5   :  { %s508_s26 = scalar_lea.vmem %s32_s25, 128  ;;  %p513_p1 = scmp.lt.s32.totalorder %s32_s25, %s32_s25 }
   0x6   :  { %p509_p0 = scmp.ne.s32.totalorder %s32_s25, %s508_s26  ;;  %p514_p2 = scmp.lt.s32.totalorder %s508_s26, %s508_s26 }
   0x8   :  { %p515_p3 = por %p514_p2, %p513_p1 }
   0xa   :  { %p516_p4 = pnand %p515_p3, %p509_p0 }
   0xc   :  { %519 = shalt.err (!%p516_p4)
}
   0xd   :  { %s609_s27 = smov 64   ;;  %s610_s28 = smov 4  }
   0xe   :  { %37 = dma.hbm_to_vmem [thread:$0]  %s711_s1, 128, %s32_s25, [#allocation6], %s609_s27, %s609_s27, %s610_s28  }
   0xf   :  { %s611_s8 = smov [#allocation2]   ;;  %s612_s10 = smov [#allocation7]  }
  0x10   :  { %s22_s9 = sshll.u32 %s611_s8, 4  ;;  %s45_s11 = sshll.u32 %s612_s10, 4  ;;  %s23_s9 = int_to_ptr.vmem [resolvable:$true] %s22_s9  ;;  %s46_s11 = int_to_ptr.vmem [resolvable:$true] %s45_s11 }
  0x11   :  { %s528_s12 = scalar_lea.vmem %s23_s9, 128  ;;  %p533_p6 = scmp.lt.s32.totalorder %s23_s9, %s23_s9 }
  0x12   :  { %p529_p5 = scmp.ne.s32.totalorder %s23_s9, %s528_s12  ;;  %p534_p7 = scmp.lt.s32.totalorder %s528_s12, %s528_s12 }
  0x14   :  { %p535_p8 = por %p534_p7, %p533_p6 }
  0x16   :  { %p536_p9 = pnand %p535_p8, %p529_p5 }
  0x18   :  { %539 = shalt.err (!%p536_p9)
}
  0x19   :  { %25 = dma.hbm_to_vmem [thread:$0]  %s710_s0, 128, %s23_s9, [#allocation3]  }
  0x1a   :  { %s548_s15 = scalar_lea.vmem %s46_s11, 1024  ;;  %p553_p11 = scmp.lt.s32.totalorder %s46_s11, %s46_s11 }
  0x1b   :  { %p549_p10 = scmp.ne.s32.totalorder %s46_s11, %s548_s15  ;;  %p554_p12 = scmp.lt.s32.totalorder %s548_s15, %s548_s15 }
  0x1d   :  { %p555_p13 = por %p554_p12, %p553_p11 }
  0x1f   :  { %p556_p0 = pnand %p555_p13, %p549_p10 }
  0x21   :  { %559 = shalt.err (!%p556_p0)
}
  0x22   :  { %51 = dma.hbm_to_vmem [thread:$0]  %s713_s3, 1024, %s46_s11, [#allocation6], %s609_s27, %s609_s27, %s610_s28  }
  0x23   :  { %s613_s17 = smov [#allocation8]  }
  0x24   :  { %s59_s18 = sshll.u32 %s613_s17, 4  ;;  %s60_s18 = int_to_ptr.vmem [resolvable:$true] %s59_s18 }
  0x25   :  { %s568_s19 = scalar_lea.vmem %s60_s18, 1024  ;;  %p573_p2 = scmp.lt.s32.totalorder %s60_s18, %s60_s18 }
  0x26   :  { %p569_p1 = scmp.ne.s32.totalorder %s60_s18, %s568_s19  ;;  %p574_p3 = scmp.lt.s32.totalorder %s568_s19, %s568_s19 }
  0x28   :  { %p575_p4 = por %p574_p3, %p573_p2 }
  0x2a   :  { %p576_p5 = pnand %p575_p4, %p569_p1 }
  0x2c   :  { %579 = shalt.err (!%p576_p5)
}
  0x2d   :  { %65 = dma.hbm_to_vmem [thread:$0]  %s715_s5, 1024, %s60_s18, [#allocation9], %s609_s27, %s609_s27, %s610_s28  }
  0x2e   :  { %600 = dma.done.wait [#allocation3], 128  }
  0x2f   :  { %601 = vsyncadd [#allocation3], 4294967168 }
  0x30   :  { %602 = dma.done.wait [#allocation6], 1152  }
  0x31   :  { %603 = vsyncadd [#allocation6], 4294966144 }
  0x32   :  { %604 = dma.done.wait [#allocation9], 1024  }
  0x33   :  { %605 = vsyncadd [#allocation9], 4294966272  ;;  %v614_v0 = vmov 0.0   ;;  %vm615_vm0 = vmmov 0   ;;  %v483_v1 = vld [vmem:[#allocation5] sm:$0xff]   ;;  %v81_v2 = vld [vmem:[#allocation2] sm:$0xff] }
  0x34   :  { %428 = vmatprep.subr.bf16.mxu0 %v614_v0  ;;  %430 = vmatprep.mubr.msk.bf16.mxu0 %vm615_vm0, %v614_v0  ;;  %v82_v3 = vpack.c.bf16 %v81_v2, %v81_v2  ;;  %vm98_vm1 = vcmask 130048   ;;  %v484_v4 = vld [vmem:[#allocation7 + $0x38] sm:$0xff]   ;;  %v485_v5 = vld [vmem:[#allocation7 + $0x30] sm:$0xff]   ;;  %v486_v6 = vld [vmem:[#allocation7 + $0x28] sm:$0xff]   ;;  %s616_s24 = smov [#allocation10]  }
  0x35   :  { %434 = vmatprep.subr.bf16.mxu1 %v614_v0  ;;  %450 = vmatprep.mubr.msk.bf16.mxu1 %vm615_vm0, %v614_v0  ;;  %v487_v7 = vld [vmem:[#allocation7 + $0x20] sm:$0xff]   ;;  %v488_v8 = vld [vmem:[#allocation7 + $0x18] sm:$0xff]   ;;  %v489_v9 = vld [vmem:[#allocation7 + $0x10] sm:$0xff]   ;;  %s376_s25 = sshll.u32 %s616_s24, 4  ;;  %s377_s25 = int_to_ptr.vmem [resolvable:$true] %s376_s25 }
  0x36   :  { %429 = vmatpush3.bf16.msra.mxu0 %v483_v1  ;;  %435 = vmatpush3.bf16.msra.mxu1 %v484_v4  ;;  %v490_v10 = vld [vmem:[#allocation7 + $0x8] sm:$0xff]   ;;  %v491_v11 = vld [vmem:[#allocation7] sm:$0xff]   ;;  %v492_v12 = vld [vmem:[#allocation8 + $0x38] sm:$0xff]   ;;  %p585_p7 = scmp.lt.s32.totalorder %s377_s25, %s377_s25 }
  0x37   :  { %454 = vmatprep.subr.bf16.mxu0 %v614_v0  ;;  %436 = vmatprep.subr.bf16.mxu1 %v614_v0  ;;  %v493_v13 = vld [vmem:[#allocation8 + $0x30] sm:$0xff]   ;;  %v494_v14 = vld [vmem:[#allocation8 + $0x28] sm:$0xff]   ;;  %v495_v15 = vld [vmem:[#allocation8 + $0x20] sm:$0xff]  }
  0x38   :  { %v496_v16 = vld [vmem:[#allocation8 + $0x18] sm:$0xff]   ;;  %v497_v17 = vld [vmem:[#allocation8 + $0x10] sm:$0xff]   ;;  %v498_v26 = vld [vmem:[#allocation8 + $0x8] sm:$0xff]  }
  0x39   :  { %431 = vmatmul.mubr.msk.bf16.vlgmr.msra.gmra.mxu0 %vm98_vm1, %v82_v3  ;;  %v387_v18 = vld [vmem:[%s712_s2] ss:$0 sm:$0xff]  ;;  %v499_v27 = vld [vmem:[#allocation8] sm:$0xff]  }
  0x3a   :  { %470 = vmatprep.mubr.msk.bf16.mxu0 %vm615_vm0, %v614_v0  ;;  %437 = vmatpush3.bf16.msra.mxu1 %v485_v5  ;;  %v390_v28 = vld [vmem:[%s714_s4] ss:$0 sm:$0xff]  ;;  %s580_s4 = scalar_lea.vmem %s377_s25, 64 }
  0x3b   :  { %438 = vmatprep.subr.bf16.mxu1 %v614_v0  ;;  %455 = vmatpush3.bf16.msra.mxu0 %v492_v12  ;;  %v399_v36 = vld [vmem:[%s716_s6] ss:$0 sm:$0xff]  ;;  %p581_p6 = scmp.ne.s32.totalorder %s377_s25, %s580_s4  ;;  %p586_p8 = scmp.lt.s32.totalorder %s580_s4, %s580_s4 }
  0x3c   :  { %456 = vmatprep.subr.bf16.mxu0 %v614_v0 }
  0x3d   :  { %p587_p9 = por %p586_p8, %p585_p7 }
  0x3e   :  { %439 = vmatpush3.bf16.msra.mxu1 %v486_v6 }
  0x3f   :  { %440 = vmatprep.subr.bf16.mxu1 %v614_v0  ;;  %457 = vmatpush3.bf16.msra.mxu0 %v493_v13  ;;  %p588_p10 = pnand %p587_p9, %p581_p6 }
  0x40   :  { %458 = vmatprep.subr.bf16.mxu0 %v614_v0 }
  0x42   :  { %441 = vmatpush3.bf16.msra.mxu1 %v487_v7 }
  0x43   :  { %442 = vmatprep.subr.bf16.mxu1 %v614_v0  ;;  %459 = vmatpush3.bf16.msra.mxu0 %v494_v14 }
  0x44   :  { %460 = vmatprep.subr.bf16.mxu0 %v614_v0 }
  0x46   :  { %443 = vmatpush3.bf16.msra.mxu1 %v488_v8 }
  0x47   :  { %444 = vmatprep.subr.bf16.mxu1 %v614_v0  ;;  %461 = vmatpush3.bf16.msra.mxu0 %v495_v15 }
  0x48   :  { %462 = vmatprep.subr.bf16.mxu0 %v614_v0 }
  0x4a   :  { %445 = vmatpush3.bf16.msra.mxu1 %v489_v9 }
  0x4b   :  { %446 = vmatprep.subr.bf16.mxu1 %v614_v0  ;;  %463 = vmatpush3.bf16.msra.mxu0 %v496_v16 }
  0x4c   :  { %464 = vmatprep.subr.bf16.mxu0 %v614_v0 }
  0x4e   :  { %447 = vmatpush3.bf16.msra.mxu1 %v490_v10 }
  0x4f   :  { %448 = vmatprep.subr.bf16.mxu1 %v614_v0  ;;  %465 = vmatpush3.bf16.msra.mxu0 %v497_v17 }
  0x50   :  { %466 = vmatprep.subr.bf16.mxu0 %v614_v0 }
  0x52   :  { %449 = vmatpush3.bf16.msra.mxu1 %v491_v11 }
  0x53   :  { %467 = vmatpush3.bf16.msra.mxu0 %v498_v26 }
  0x54   :  { %468 = vmatprep.subr.bf16.mxu0 %v614_v0 }
  0x57   :  { %469 = vmatpush3.bf16.msra.mxu0 %v499_v27 }
  0xf9   :  { %v136_v19 = vpop.f32.mrf.mxu0 }
  0xfa   :  { %v137_v20 = vadd.f32 %v387_v18, %v136_v19 }
  0xfb   :  { %v432_v21 = vpop.f32.mrf.mxu0 }
  0xfc   :  { %v142_v22 = vmax.f32 %v137_v20, 0.0 }
  0xfd   :  { %v139_v23 = vpop.f32.mrf.mxu0 }
  0xfe   :  { %v143_v24 = vpack.c.bf16 %v142_v22, %v142_v22 }
  0xff   :  { %v433_v25 = vpop.f32.mrf.mxu0 }
 0x100   :  { %451 = vmatmul.mubr.bf16.vlgmr.msra.gmra.mxu1 %v143_v24 }
 0x1c0   :  { %v249_v29 = vpop.f32.mrf.mxu1 }
 0x1c1   :  { %v250_v30 = vadd.f32 %v390_v28, %v249_v29 }
 0x1c2   :  { %v452_v31 = vpop.f32.mrf.mxu1 }
 0x1c3   :  { %v255_v32 = vmax.f32 %v250_v30, 0.0 }
 0x1c4   :  { %v252_v33 = vpop.f32.mrf.mxu1 }
 0x1c5   :  { %v256_v34 = vpack.c.bf16 %v255_v32, %v255_v32 }
 0x1c6   :  { %v453_v35 = vpop.f32.mrf.mxu1 }
 0x1c7   :  { %471 = vmatmul.mubr.bf16.vlgmr.msra.gmra.mxu0 %v256_v34 }
 0x287   :  { %v362_v37 = vpop.f32.mrf.mxu0 }
 0x288   :  { %v363_v38 = vadd.f32 %v399_v36, %v362_v37 }
 0x289   :  { %v472_v39 = vpop.f32.mrf.mxu0 }
 0x28a   :  { %v368_v40 = vpack.c.bf16 %v363_v38, %v363_v38 }
 0x28b   :  { %v365_v41 = vpop.f32.mrf.mxu0 }
 0x28c   :  { %369 = vst [vmem:[#allocation10] sm:$0xf] %v368_v40 }
 0x28d   :  { %v473_v42 = vpop.f32.mrf.mxu0 }
 0x28e   :  { %591 = shalt.err (!%p588_p10)
}
 0x28f   :  { %379 = dma.vmem_to_hbm [thread:$0]  %s377_s25, 64, %s717_s7, [#allocation4]  }
 0x290   :  { %606 = dma.done.wait [#allocation4], 64  }
 0x291   :  { %607 = vsyncadd [#allocation4], 4294967232 }
 0x292   :  { %383 = vsyncpa [#allocation3], 1 }
 0x293   :  { %384 = vsyncpa [#allocation6], 1 }
 0x294   :  { %385 = vsyncpa [#allocation9], 1 }
 0x295   :  { %386 = vsyncpa [#allocation4], 1 }

</bundles_post_ra>
